<compile_context>
chip_gen: v6e
topology: v6e:2x2x1
jax: 0.10.0
libtpu: 0.0.40
codegen_flags: <defaults>
</compile_context>

<pallas_src>
import math

import jax
import jax.numpy as jnp
from jax.experimental import pallas as pl
from jax.experimental.pallas import tpu as pltpu

# ---- model hyper-parameters (small, consistent with the module's __init__) ----
INPUT_DIM = 16
HIDDEN_DIMS = (32, 32)
OUTPUT_DIM = 8
MAX_ACTION = 2.0
BATCH = 64          # demo batch; the wrapper handles any B via padding + grid

LANE = 128          # TPU lane width; output is padded to a multiple of this
DEFAULT_TILE_B = 256


def _round_up(n, m):
    return ((n + m - 1) // m) * m


def actor_kernel(x_ref, w1_ref, b1_ref, w2_ref, b2_ref, w3_ref, b3_ref, o_ref):
    """Fused MLP forward for one (TB, in_dim) batch tile.

    Matmuls run on the MXU with bf16 operands / f32 accumulation; the
    ReLU / tanh / max_action-scale epilogue stays in f32 (VPU + EUP).
    """
    # Biases read once per tile (f32).
    b1 = b1_ref[...]
    b2 = b2_ref[...]
    b3 = b3_ref[...]

    x = x_ref[...].astype(jnp.bfloat16)

    h = jnp.dot(x, w1_ref[...], preferred_element_type=jnp.float32) + b1
    h = jnp.maximum(h, 0.0)

    h = jnp.dot(h.astype(jnp.bfloat16), w2_ref[...],
                preferred_element_type=jnp.float32) + b2
    h = jnp.maximum(h, 0.0)

    h = jnp.dot(h.astype(jnp.bfloat16), w3_ref[...],
                preferred_element_type=jnp.float32) + b3

    # Full-width (lane-dense, 128-wide) store.
    o_ref[...] = (MAX_ACTION * jnp.tanh(h)).astype(o_ref.dtype)


def actor_forward(x, params, *, tile_b=DEFAULT_TILE_B):
    """params = (w1, b1, w2, b2, w3, b3); w* shaped (in, out), b* shaped (1, out)."""
    w1, b1, w2, b2, w3, b3 = params
    B, in_dim = x.shape
    h1 = w1.shape[1]
    h2 = w2.shape[1]
    out_dim = w3.shape[1]

    # ---- lane-dense output: pad the last layer to a multiple of 128 columns ----
    out_pad = _round_up(max(out_dim, LANE), LANE)
    w3p = jnp.zeros((h2, out_pad), w3.dtype).at[:, :out_dim].set(w3)
    b3p = jnp.zeros((1, out_pad), b3.dtype).at[:, :out_dim].set(b3)

    # ---- bf16 matmul operands (f32 accumulation happens in-kernel) ----
    w1b = w1.astype(jnp.bfloat16)
    w2b = w2.astype(jnp.bfloat16)
    w3b = w3p.astype(jnp.bfloat16)

    # ---- batch tiling: pad B to a multiple of the tile, grid over batch ----
    tb = min(tile_b, max(8, _round_up(B, 8)))
    b_pad = _round_up(B, tb)
    if b_pad != B:
        x = jnp.pad(x, ((0, b_pad - B), (0, 0)))
    grid_b = b_pad // tb

    flops = 2 * b_pad * (in_dim * h1 + h1 * h2 + h2 * out_pad)
    transcendentals = b_pad * out_pad  # tanh
    bytes_accessed = (
        b_pad * in_dim * 4                       # x (f32)
        + (in_dim * h1 + h1 * h2 + h2 * out_pad) * 2   # bf16 weights
        + (h1 + h2 + out_pad) * 4                # f32 biases
        + b_pad * out_pad * 4                    # output (f32)
    )

    out = pl.pallas_call(
        actor_kernel,
        out_shape=jax.ShapeDtypeStruct((b_pad, out_pad), jnp.float32),
        grid=(grid_b,),
        in_specs=[
            pl.BlockSpec((tb, in_dim), lambda i: (i, 0)),       # x: tiled over batch
            pl.BlockSpec((in_dim, h1), lambda i: (0, 0)),       # w1: resident
            pl.BlockSpec((1, h1), lambda i: (0, 0)),            # b1: resident
            pl.BlockSpec((h1, h2), lambda i: (0, 0)),           # w2: resident
            pl.BlockSpec((1, h2), lambda i: (0, 0)),            # b2: resident
            pl.BlockSpec((h2, out_pad), lambda i: (0, 0)),      # w3 (padded): resident
            pl.BlockSpec((1, out_pad), lambda i: (0, 0)),       # b3 (padded): resident
        ],
        out_specs=pl.BlockSpec((tb, out_pad), lambda i: (i, 0)),
        compiler_params=pltpu.CompilerParams(
            dimension_semantics=("parallel",),                  # shard batch across TCs
        ),
        cost_estimate=pl.CostEstimate(
            flops=flops,
            transcendentals=transcendentals,
            bytes_accessed=bytes_accessed,
        ),
    )(x, w1b, b1, w2b, b2, w3b, b3p)

    # Slice back to the real batch / action dims (cheap XLA slice).
    return out[:B, :out_dim]


def init_linear(key, fan_in, fan_out):
    """Deterministic init mimicking PyTorch nn.Linear default (U(-1/sqrt(fan_in), +))."""
    kw, kb = jax.random.split(key)
    bound = 1.0 / math.sqrt(fan_in)
    # Stored transposed relative to PyTorch: shape (fan_in, fan_out).
    w = jax.random.uniform(kw, (fan_in, fan_out), jnp.float32, -bound, bound)
    b = jax.random.uniform(kb, (1, fan_out), jnp.float32, -bound, bound)
    return w, b


def init_actor_params(key):
    dims = (INPUT_DIM,) + HIDDEN_DIMS + (OUTPUT_DIM,)
    params = []
    for i in range(len(dims) - 1):
        key, sub = jax.random.split(key)
        w, b = init_linear(sub, dims[i], dims[i + 1])
        params.extend([w, b])
    return tuple(params)


if __name__ == "__main__":
    key = jax.random.PRNGKey(0)
    k_params, k_x = jax.random.split(key)

    params = init_actor_params(k_params)
    x = jax.random.normal(k_x, (BATCH, INPUT_DIM), jnp.float32)

    out = actor_forward(x, params)
    out = jax.block_until_ready(out)

    # Sanity checks: shape and tanh-bounded output scaled by max_action.
    assert out.shape == (BATCH, OUTPUT_DIM)
    assert bool(jnp.all(jnp.abs(out) <= MAX_ACTION + 1e-5))

    # Reference with identical numerics (bf16 operands, f32 accumulation).
    def ref_forward_bf16(x, params):
        w1, b1, w2, b2, w3, b3 = params

        def mm(a, w):
            return jnp.dot(a.astype(jnp.bfloat16), w.astype(jnp.bfloat16),
                           preferred_element_type=jnp.float32)

        h = jnp.maximum(mm(x, w1) + b1, 0.0)
        h = jnp.maximum(mm(h, w2) + b2, 0.0)
        return MAX_ACTION * jnp.tanh(mm(h, w3) + b3)

    # Full-precision reference (matches the PyTorch module's math exactly).
    def ref_forward_f32(x, params):
        w1, b1, w2, b2, w3, b3 = params
        h = jnp.maximum(x @ w1 + b1, 0.0)
        h = jnp.maximum(h @ w2 + b2, 0.0)
        return MAX_ACTION * jnp.tanh(h @ w3 + b3)

    ref_bf16 = ref_forward_bf16(x, params)
    ref_f32 = ref_forward_f32(x, params)

    assert bool(jnp.allclose(out, ref_bf16, atol=2e-3, rtol=2e-3)), "mismatch vs bf16 reference"
    assert bool(jnp.allclose(out, ref_f32, atol=5e-2, rtol=5e-2)), "mismatch vs f32 reference"

    print("KERNEL_OK")
</pallas_src>

<mosaic_0001>
module attributes {stable_mosaic.version = 11 : i64} {
  func.func @actor_kernel(%arg0: i32, %arg1: memref<64x16xf32, #tpu.memory_space<vmem>>, %arg2: memref<16x32xbf16, #tpu.memory_space<vmem>>, %arg3: memref<1x32xf32, #tpu.memory_space<vmem>>, %arg4: memref<32x32xbf16, #tpu.memory_space<vmem>>, %arg5: memref<1x32xf32, #tpu.memory_space<vmem>>, %arg6: memref<32x128xbf16, #tpu.memory_space<vmem>>, %arg7: memref<1x128xf32, #tpu.memory_space<vmem>>, %arg8: memref<64x128xf32, #tpu.memory_space<vmem>>) attributes {dimension_semantics = [#tpu.dimension_semantics<parallel>], iteration_bounds = array<i64: 1>, scalar_prefetch = 0 : i64, scratch_operands = 0 : i64, tpu.core_type = #tpu.core_type<tc>, window_params = [{transform_indices = @transform_0, window_bounds = array<i64: 64, 16>}, {pipeline_mode = #tpu.pipeline_mode<synchronous>, transform_indices = @transform_1, window_bounds = array<i64: 16, 32>}, {pipeline_mode = #tpu.pipeline_mode<synchronous>, transform_indices = @transform_2, window_bounds = array<i64: 1, 32>}, {pipeline_mode = #tpu.pipeline_mode<synchronous>, transform_indices = @transform_3, window_bounds = array<i64: 32, 32>}, {pipeline_mode = #tpu.pipeline_mode<synchronous>, transform_indices = @transform_4, window_bounds = array<i64: 1, 32>}, {pipeline_mode = #tpu.pipeline_mode<synchronous>, transform_indices = @transform_5, window_bounds = array<i64: 32, 128>}, {pipeline_mode = #tpu.pipeline_mode<synchronous>, transform_indices = @transform_6, window_bounds = array<i64: 1, 128>}, {transform_indices = @transform_7, window_bounds = array<i64: 64, 128>}]} {
    %c0 = arith.constant 0 : index
    %c0_0 = arith.constant 0 : index
    %0 = vector.load %arg3[%c0, %c0_0] : memref<1x32xf32, #tpu.memory_space<vmem>>, vector<1x32xf32>
    %c0_1 = arith.constant 0 : index
    %c0_2 = arith.constant 0 : index
    %1 = vector.load %arg5[%c0_1, %c0_2] : memref<1x32xf32, #tpu.memory_space<vmem>>, vector<1x32xf32>
    %c0_3 = arith.constant 0 : index
    %c0_4 = arith.constant 0 : index
    %2 = vector.load %arg7[%c0_3, %c0_4] : memref<1x128xf32, #tpu.memory_space<vmem>>, vector<1x128xf32>
    %c0_5 = arith.constant 0 : index
    %c0_6 = arith.constant 0 : index
    %3 = vector.load %arg1[%c0_5, %c0_6] : memref<64x16xf32, #tpu.memory_space<vmem>>, vector<64x16xf32>
    %4 = arith.truncf %3 : vector<64x16xf32> to vector<64x16xbf16>
    %c0_7 = arith.constant 0 : index
    %c0_8 = arith.constant 0 : index
    %5 = vector.load %arg2[%c0_7, %c0_8] : memref<16x32xbf16, #tpu.memory_space<vmem>>, vector<16x32xbf16>
    %cst = arith.constant dense<0.000000e+00> : vector<64x32xf32>
    %6 = tpu.matmul %4, %5, %cst {dimension_numbers = #tpu.dot_dimension_numbers<[1], [0], [0], [1], [0, 0, 1, 1], [], []>} : vector<64x16xbf16>, vector<16x32xbf16>, vector<64x32xf32> -> vector<64x32xf32>
    %7 = vector.broadcast %0 : vector<1x32xf32> to vector<64x32xf32>
    %8 = arith.addf %6, %7 : vector<64x32xf32>
    %cst_9 = arith.constant 0.000000e+00 : f32
    %9 = vector.broadcast %cst_9 : f32 to vector<64x32xf32>
    %10 = arith.maximumf %8, %9 : vector<64x32xf32>
    %11 = arith.truncf %10 : vector<64x32xf32> to vector<64x32xbf16>
    %c0_10 = arith.constant 0 : index
    %c0_11 = arith.constant 0 : index
    %12 = vector.load %arg4[%c0_10, %c0_11] : memref<32x32xbf16, #tpu.memory_space<vmem>>, vector<32x32xbf16>
    %cst_12 = arith.constant dense<0.000000e+00> : vector<64x32xf32>
    %13 = tpu.matmul %11, %12, %cst_12 {dimension_numbers = #tpu.dot_dimension_numbers<[1], [0], [0], [1], [0, 0, 1, 1], [], []>} : vector<64x32xbf16>, vector<32x32xbf16>, vector<64x32xf32> -> vector<64x32xf32>
    %14 = vector.broadcast %1 : vector<1x32xf32> to vector<64x32xf32>
    %15 = arith.addf %13, %14 : vector<64x32xf32>
    %cst_13 = arith.constant 0.000000e+00 : f32
    %16 = vector.broadcast %cst_13 : f32 to vector<64x32xf32>
    %17 = arith.maximumf %15, %16 : vector<64x32xf32>
    %18 = arith.truncf %17 : vector<64x32xf32> to vector<64x32xbf16>
    %c0_14 = arith.constant 0 : index
    %c0_15 = arith.constant 0 : index
    %19 = vector.load %arg6[%c0_14, %c0_15] : memref<32x128xbf16, #tpu.memory_space<vmem>>, vector<32x128xbf16>
    %cst_16 = arith.constant dense<0.000000e+00> : vector<64x128xf32>
    %20 = tpu.matmul %18, %19, %cst_16 {dimension_numbers = #tpu.dot_dimension_numbers<[1], [0], [0], [1], [0, 0, 1, 1], [], []>} : vector<64x32xbf16>, vector<32x128xbf16>, vector<64x128xf32> -> vector<64x128xf32>
    %21 = vector.broadcast %2 : vector<1x128xf32> to vector<64x128xf32>
    %22 = arith.addf %20, %21 : vector<64x128xf32>
    %23 = math.tanh %22 : vector<64x128xf32>
    %cst_17 = arith.constant 2.000000e+00 : f32
    %24 = vector.broadcast %cst_17 : f32 to vector<64x128xf32>
    %25 = arith.mulf %24, %23 : vector<64x128xf32>
    %c0_18 = arith.constant 0 : index
    %c0_19 = arith.constant 0 : index
    %26 = vector.load %arg8[%c0_18, %c0_19] : memref<64x128xf32, #tpu.memory_space<vmem>>, vector<64x128xf32>
    tpu.vector_store %arg8[%c0_18, %c0_19], %25 {strides = array<i32>} : memref<64x128xf32, #tpu.memory_space<vmem>>, vector<64x128xf32>,
    return
  }
  func.func @transform_0(%arg0: i32) -> (i32, i32) {
    %c0_i32 = arith.constant 0 : i32
    %c0_i32_0 = arith.constant 0 : i32
    return %arg0, %c0_i32 : i32, i32
  }
  func.func @transform_1(%arg0: i32) -> (i32, i32) {
    %c0_i32 = arith.constant 0 : i32
    %c0_i32_0 = arith.constant 0 : i32
    %c0_i32_1 = arith.constant 0 : i32
    return %c0_i32, %c0_i32_0 : i32, i32
  }
  func.func @transform_2(%arg0: i32) -> (i32, i32) {
    %c0_i32 = arith.constant 0 : i32
    %c0_i32_0 = arith.constant 0 : i32
    %c0_i32_1 = arith.constant 0 : i32
    return %c0_i32, %c0_i32_0 : i32, i32
  }
  func.func @transform_3(%arg0: i32) -> (i32, i32) {
    %c0_i32 = arith.constant 0 : i32
    %c0_i32_0 = arith.constant 0 : i32
    %c0_i32_1 = arith.constant 0 : i32
    return %c0_i32, %c0_i32_0 : i32, i32
  }
  func.func @transform_4(%arg0: i32) -> (i32, i32) {
    %c0_i32 = arith.constant 0 : i32
    %c0_i32_0 = arith.constant 0 : i32
    %c0_i32_1 = arith.constant 0 : i32
    return %c0_i32, %c0_i32_0 : i32, i32
  }
  func.func @transform_5(%arg0: i32) -> (i32, i32) {
    %c0_i32 = arith.constant 0 : i32
    %c0_i32_0 = arith.constant 0 : i32
    %c0_i32_1 = arith.constant 0 : i32
    return %c0_i32, %c0_i32_0 : i32, i32
  }
  func.func @transform_6(%arg0: i32) -> (i32, i32) {
    %c0_i32 = arith.constant 0 : i32
    %c0_i32_0 = arith.constant 0 : i32
    %c0_i32_1 = arith.constant 0 : i32
    return %c0_i32, %c0_i32_0 : i32, i32
  }
  func.func @transform_7(%arg0: i32) -> (i32, i32) {
    %c0_i32 = arith.constant 0 : i32
    %c0_i32_0 = arith.constant 0 : i32
    return %arg0, %c0_i32 : i32, i32
  }
}

</mosaic_0001>

<bundles_post_ra>
// kernel: tpu_custom_call.1
= control target key start
LH: loop header
LB: loop body
LE: loop exit
PB: predicated region body
PF: predicated region fallthrough
CT: control target
= control target key end

     0   :  { %vm57_vm0 = vcmask 130048   ;;  %s623_s0 = inlined_call_operand.vmem [shape: f32[64,16], index: 0, kind: input, shape index: {}]   ;;  %s624_s1 = inlined_call_operand.vmem [shape: bf16[16,32], index: 1, kind: input, shape index: {}]   ;;  %s625_s2 = inlined_call_operand.vmem [shape: f32[1,32], index: 2, kind: input, shape index: {}]   ;;  %s626_s3 = inlined_call_operand.vmem [shape: bf16[32,32], index: 3, kind: input, shape index: {}]   ;;  %s627_s4 = inlined_call_operand.vmem [shape: f32[1,32], index: 4, kind: input, shape index: {}]   ;;  %s628_s5 = inlined_call_operand.vmem [shape: bf16[32,128], index: 5, kind: input, shape index: {}]   ;;  %s629_s6 = inlined_call_operand.vmem [shape: f32[1,128], index: 6, kind: input, shape index: {}]   ;;  %s630_s7 = inlined_call_operand.hbm [shape: f32[64,128], index: 7, kind: output, shape index: {}]  }
   0x1   :  { %v474_v0 = vld [vmem:[%s624_s1] sm:$0xff]   ;;  %v32_v2 = vld [vmem:[%s623_s0 + $0x8] sm:$0xff]  ;;  %v33_v3 = vld [vmem:[%s623_s0 + $0x10] sm:$0xff] }
   0x2   :  { %v31_v1 = vld [vmem:[%s623_s0] sm:$0xff]  ;;  %435 = vmatprep.subr.bf16.mxu0 %v474_v0  ;;  %469 = vmatprep.subr.bf16.mxu1 %v474_v0  ;;  %v34_v5 = vld [vmem:[%s623_s0 + $0x18] sm:$0xff]  ;;  %v36_v7 = vld [vmem:[%s623_s0 + $0x28] sm:$0xff] }
   0x3   :  { %v39_v4 = vpack.c.bf16 %v32_v2, %v31_v1  ;;  %v35_v6 = vld [vmem:[%s623_s0 + $0x20] sm:$0xff]  ;;  %436 = vmatpush3.bf16.msra.mxu0 %v474_v0  ;;  %470 = vmatpush3.bf16.msra.mxu1 %v474_v0  ;;  %v40_v8 = vpack.c.bf16 %v34_v5, %v33_v3  ;;  %v37_v10 = vld [vmem:[%s623_s0 + $0x30] sm:$0xff]  ;;  %v38_v11 = vld [vmem:[%s623_s0 + $0x38] sm:$0xff] }
   0x4   :  { %v41_v9 = vpack.c.bf16 %v36_v7, %v35_v6  ;;  %v42_v12 = vpack.c.bf16 %v38_v11, %v37_v10 }
   0x5   :  { %437 = vmatprep.mubr.msk.bf16.mxu0 %vm57_vm0, %v39_v4 }
   0x6   :  { %441 = vmatprep.mubr.msk.bf16.mxu1 %vm57_vm0, %v41_v9  ;;  %438 = vmatmul.mubr.msk.bf16.vlgmr.msra.gmra.mxu0 %vm57_vm0, %v40_v8 }
   0x7   :  { %442 = vmatmul.mubr.msk.bf16.vlgmr.msra.gmra.mxu1 %vm57_vm0, %v42_v12 }
   0x8   :  { %12 = vsyncpa [#allocation3], 0  ;;  %v475_v13 = vld [vmem:[%s626_s3 + $0x8] sm:$0xff]   ;;  %v476_v14 = vld [vmem:[%s626_s3] sm:$0xff]   ;;  %vm169_vm1 = vcmask 261120  }
   0x9   :  { %445 = vmatprep.subr.bf16.mxu1 %v475_v13  ;;  %v398_v17 = vld [vmem:[%s625_s2] ss:$0 sm:$0xff]  ;;  %v477_v44 = vld [vmem:[%s628_s5 + $0x8] sm:$0xff]  }
   0xa   :  { %446 = vmatpush3.bf16.msra.mxu1 %v475_v13  ;;  %457 = vmatprep.subr.bf16.mxu0 %v477_v44  ;;  %v478_v45 = vld [vmem:[%s628_s5] sm:$0xff]  }
   0xb   :  { %447 = vmatprep.subr.bf16.mxu1 %v476_v14  ;;  %458 = vmatpush3.bf16.msra.mxu0 %v477_v44  ;;  %v404_v48 = vld [vmem:[%s627_s4] ss:$0 sm:$0xff] }
   0xc   :  { %459 = vmatprep.subr.bf16.mxu0 %v478_v45  ;;  %v411_v11 = vld [vmem:[%s629_s6] ss:$0 sm:$0xff]  ;;  %s517_s6 = smov [#allocation2]  }
   0xd   :  { %s387_s27 = sshll.u32 %s517_s6, 4  ;;  %s388_s27 = int_to_ptr.vmem [resolvable:$true] %s387_s27 }
   0xe   :  { %448 = vmatpush3.bf16.msra.mxu1 %v476_v14  ;;  %s495_s28 = scalar_lea.vmem %s388_s27, 1024  ;;  %p500_p1 = scmp.lt.s32.totalorder %s388_s27, %s388_s27 }
   0xf   :  { %460 = vmatpush3.bf16.msra.mxu0 %v478_v45  ;;  %p496_p0 = scmp.ne.s32.totalorder %s388_s27, %s495_s28  ;;  %p501_p2 = scmp.lt.s32.totalorder %s495_s28, %s495_s28 }
  0x11   :  { %p502_p3 = por %p501_p2, %p500_p1 }
  0x13   :  { %p503_p4 = pnand %p502_p3, %p496_p0 }
  0xc6   :  { %v439_v15 = vpop.f32.mrf.mxu0 }
  0xc7   :  { %v443_v16 = vpop.f32.mrf.mxu1  ;;  %v113_v25 = vadd.f32 %v439_v15, %v398_v17 }
  0xc8   :  { %v104_v18 = vpop.f32.mrf.mxu0  ;;  %v129_v38 = vadd.f32 %v443_v16, %v398_v17 }
  0xc9   :  { %v120_v19 = vpop.f32.mrf.mxu1  ;;  %v105_v23 = vadd.f32 %v398_v17, %v104_v18  ;;  %v137_v35 = vmax.f32 %v113_v25, 0.0 }
  0xca   :  { %v121_v20 = vadd.f32 %v398_v17, %v120_v19  ;;  %v440_v21 = vpop.f32.mrf.mxu0  ;;  %v141_v41 = vmax.f32 %v129_v38, 0.0 }
  0xcb   :  { %v444_v22 = vpop.f32.mrf.mxu1  ;;  %v116_v24 = vadd.f32 %v440_v21, %v398_v17  ;;  %v135_v32 = vmax.f32 %v105_v23, 0.0 }
  0xcc   :  { %v107_v26 = vpop.f32.mrf.mxu0  ;;  %v139_v28 = vmax.f32 %v121_v20, 0.0  ;;  %v132_v40 = vadd.f32 %v444_v22, %v398_v17 }
  0xcd   :  { %v123_v27 = vpop.f32.mrf.mxu1  ;;  %v108_v29 = vadd.f32 %v398_v17, %v107_v26  ;;  %v138_v31 = vmax.f32 %v116_v24, 0.0 }
  0xce   :  { %v124_v30 = vadd.f32 %v398_v17, %v123_v27  ;;  %v142_v42 = vmax.f32 %v132_v40, 0.0 }
  0xcf   :  { %v136_v33 = vmax.f32 %v108_v29, 0.0  ;;  %v144_v39 = vpack.c.bf16 %v138_v31, %v137_v35 }
  0xd0   :  { %v140_v34 = vmax.f32 %v124_v30, 0.0  ;;  %v146_v43 = vpack.c.bf16 %v142_v42, %v141_v41 }
  0xd1   :  { %v143_v36 = vpack.c.bf16 %v136_v33, %v135_v32 }
  0xd2   :  { %v145_v37 = vpack.c.bf16 %v140_v34, %v139_v28 }
  0xd3   :  { %449 = vmatprep.mubr.msk.bf16.mxu1 %vm169_vm1, %v143_v36 }
  0xd4   :  { %450 = vmatmul.mubr.msk.bf16.vlgmr.msra.gmra.mxu1 %vm169_vm1, %v144_v39 }
  0xd5   :  { %453 = vmatprep.mubr.msk.bf16.mxu1 %vm169_vm1, %v145_v37 }
  0xdc   :  { %454 = vmatmul.mubr.msk.bf16.gmra.mxu1 %vm169_vm1, %v146_v43 }
 0x194   :  { %v451_v46 = vpop.f32.mrf.mxu1 }
 0x195   :  { %v225_v52 = vadd.f32 %v451_v46, %v404_v48 }
 0x196   :  { %v216_v47 = vpop.f32.mrf.mxu1 }
 0x197   :  { %v217_v50 = vadd.f32 %v404_v48, %v216_v47  ;;  %v249_v59 = vmax.f32 %v225_v52, 0.0 }
 0x198   :  { %v452_v49 = vpop.f32.mrf.mxu1 }
 0x199   :  { %v228_v51 = vadd.f32 %v452_v49, %v404_v48  ;;  %v247_v57 = vmax.f32 %v217_v50, 0.0 }
 0x19a   :  { %v219_v53 = vpop.f32.mrf.mxu1 }
 0x19b   :  { %v220_v54 = vadd.f32 %v404_v48, %v219_v53  ;;  %v250_v55 = vmax.f32 %v228_v51, 0.0 }
 0x19c   :  { %v455_v56 = vpop.f32.mrf.mxu1 }
 0x19d   :  { %v248_v58 = vmax.f32 %v220_v54, 0.0  ;;  %v256_v62 = vpack.c.bf16 %v250_v55, %v249_v59  ;;  %v241_v2 = vadd.f32 %v455_v56, %v404_v48 }
 0x19e   :  { %v232_v60 = vpop.f32.mrf.mxu1 }
 0x19f   :  { %v255_v61 = vpack.c.bf16 %v248_v58, %v247_v57  ;;  %v233_v0 = vadd.f32 %v404_v48, %v232_v60  ;;  %v253_v8 = vmax.f32 %v241_v2, 0.0 }
 0x1a0   :  { %v456_v63 = vpop.f32.mrf.mxu1 }
 0x1a1   :  { %v244_v1 = vadd.f32 %v456_v63, %v404_v48  ;;  %461 = vmatprep.mubr.msk.bf16.mxu0 %vm169_vm1, %v255_v61  ;;  %v251_v6 = vmax.f32 %v233_v0, 0.0 }
 0x1a2   :  { %v235_v3 = vpop.f32.mrf.mxu1  ;;  %462 = vmatmul.mubr.msk.bf16.vlgmr.msra.gmra.mxu0 %vm169_vm1, %v256_v62 }
 0x1a3   :  { %v236_v4 = vadd.f32 %v404_v48, %v235_v3  ;;  %v254_v5 = vmax.f32 %v244_v1, 0.0 }
 0x1a5   :  { %v252_v7 = vmax.f32 %v236_v4, 0.0  ;;  %v258_v10 = vpack.c.bf16 %v254_v5, %v253_v8 }
 0x1a7   :  { %v257_v9 = vpack.c.bf16 %v252_v7, %v251_v6 }
 0x1a9   :  { %465 = vmatprep.mubr.msk.bf16.mxu0 %vm169_vm1, %v257_v9 }
 0x1aa   :  { %466 = vmatmul.mubr.msk.bf16.gmra.mxu0 %vm169_vm1, %v258_v10 }
 0x262   :  { %v463_v12 = vpop.f32.mrf.mxu0 }
 0x263   :  { %v336_v13 = vadd.f32 %v463_v12, %v411_v11 }
 0x264   :  { %v327_v14 = vpop.f32.mrf.mxu0 }
 0x265   :  { %479 = vtanh.f32 %v336_v13  ;;  %v328_v15 = vadd.f32 %v411_v11, %v327_v14 }
 0x266   :  { %v464_v16 = vpop.f32.mrf.mxu0 }
 0x267   :  { %481 = vtanh.f32 %v328_v15  ;;  %v339_v17 = vadd.f32 %v464_v16, %v411_v11 }
 0x268   :  { %v330_v18 = vpop.f32.mrf.mxu0 }
 0x269   :  { %483 = vtanh.f32 %v339_v17  ;;  %v331_v19 = vadd.f32 %v411_v11, %v330_v18 }
 0x26a   :  { %v467_v20 = vpop.f32.mrf.mxu0 }
 0x26b   :  { %485 = vtanh.f32 %v331_v19  ;;  %v352_v21 = vadd.f32 %v467_v20, %v411_v11 }
 0x26c   :  { %v343_v22 = vpop.f32.mrf.mxu0 }
 0x26d   :  { %487 = vtanh.f32 %v352_v21  ;;  %v344_v23 = vadd.f32 %v411_v11, %v343_v22 }
 0x26e   :  { %v468_v24 = vpop.f32.mrf.mxu0 }
 0x26f   :  { %489 = vtanh.f32 %v344_v23  ;;  %v355_v25 = vadd.f32 %v468_v24, %v411_v11 }
 0x270   :  { %v346_v26 = vpop.f32.mrf.mxu0 }
 0x271   :  { %491 = vtanh.f32 %v355_v25  ;;  %v347_v27 = vadd.f32 %v411_v11, %v346_v26 }
 0x272   :  { %v480_v28 = vpop.eup %479 }
 0x273   :  { %v368_v29 = vmul.f32 2.0, %v480_v28  ;;  %493 = vtanh.f32 %v347_v27 }
 0x274   :  { %v482_v30 = vpop.eup %481 }
 0x275   :  { %376 = vst [vmem:[#allocation2 + $0x10] sm:$0xff] %v368_v29  ;;  %v366_v31 = vmul.f32 2.0, %v482_v30 }
 0x276   :  { %v484_v32 = vpop.eup %483 }
 0x277   :  { %374 = vst [vmem:[#allocation2] sm:$0xff] %v366_v31  ;;  %v369_v33 = vmul.f32 2.0, %v484_v32 }
 0x278   :  { %v486_v34 = vpop.eup %485 }
 0x279   :  { %377 = vst [vmem:[#allocation2 + $0x18] sm:$0xff] %v369_v33  ;;  %v367_v35 = vmul.f32 2.0, %v486_v34 }
 0x27a   :  { %v488_v36 = vpop.eup %487 }
 0x27b   :  { %375 = vst [vmem:[#allocation2 + $0x8] sm:$0xff] %v367_v35  ;;  %v372_v37 = vmul.f32 2.0, %v488_v36 }
 0x27c   :  { %v490_v38 = vpop.eup %489 }
 0x27d   :  { %380 = vst [vmem:[#allocation2 + $0x30] sm:$0xff] %v372_v37  ;;  %v370_v39 = vmul.f32 2.0, %v490_v38 }
 0x27e   :  { %v492_v40 = vpop.eup %491 }
 0x27f   :  { %378 = vst [vmem:[#allocation2 + $0x20] sm:$0xff] %v370_v39  ;;  %v373_v41 = vmul.f32 2.0, %v492_v40 }
 0x280   :  { %v494_v42 = vpop.eup %493 }
 0x281   :  { %381 = vst [vmem:[#allocation2 + $0x38] sm:$0xff] %v373_v41  ;;  %v371_v43 = vmul.f32 2.0, %v494_v42 }
 0x283   :  { %379 = vst [vmem:[#allocation2 + $0x28] sm:$0xff] %v371_v43 }
 0x284   :  { %506 = shalt.err (!%p503_p4)
}
 0x285   :  { %s518_s29 = smov 128   ;;  %s519_s30 = smov 8  }
 0x286   :  { %393 = dma.vmem_to_hbm [thread:$0]  %s388_s27, 1024, %s630_s7, [#allocation3], %s518_s29, %s518_s29, %s519_s30  }
 0x287   :  { %515 = dma.done.wait [#allocation3], 1024  }
 0x288   :  { %516 = vsyncadd [#allocation3], 4294966272 }
 0x289   :  { %397 = vsyncpa [#allocation3], 1 }

</bundles_post_ra>
